<compile_context>
chip_gen: v5e
topology: v5e:2x2
jax: 0.10.0
libtpu: 0.0.40
codegen_flags: <defaults>
</compile_context>

<pallas_src>
import functools

import jax
import jax.numpy as jnp
from jax.experimental import pallas as pl
from jax.experimental.pallas import tpu as pltpu

NEG_SLOPE = 0.2      # PyG GATConv default negative_slope
NEG_INF = -1e30      # finite sentinel used only in the pure-JAX reference


def _round_up(v, m):
    return ((v + m - 1) // m) * m


def _pick_tile(n, cap, want_blocks=1):
    """Largest divisor of n <= cap, trying to keep >= want_blocks blocks."""
    cap = min(cap, max(n // want_blocks, 128), n)
    t = cap
    while n % t:
        t //= 2
    return t


def _pad2(a, rows, cols):
    return jnp.pad(a, ((0, rows - a.shape[0]), (0, cols - a.shape[1])))


# ---------------------------------------------------------------------------
# Kernel 1: fused projections
#   x @ [w_src | w_lin | w_src@att_src^T | w_dst@att_dst^T]
# ---------------------------------------------------------------------------
def _proj_kernel(x_ref, w_cat_ref, bias_ref,
                 h_src_ref, skip_ref, a_src_ref, a_dst_ref, *, c_pad):
    x = x_ref[...].astype(jnp.bfloat16)                       # [TR, Fp]
    h = jnp.dot(x, w_cat_ref[...],
                preferred_element_type=jnp.float32)           # [TR, 2*Cp+128]
    h_src_ref[...] = h[:, :c_pad].astype(jnp.bfloat16)
    skip_ref[...] = (h[:, c_pad:2 * c_pad]
                     + bias_ref[...]).astype(jnp.bfloat16)    # b_conv+b_lin
    a_src_ref[...] = h[:, 2 * c_pad:2 * c_pad + 1]            # MXU-folded scores
    a_dst_ref[...] = h[:, 2 * c_pad + 1:2 * c_pad + 2]


# ---------------------------------------------------------------------------
# Kernel 2: masked softmax (static shift) + aggregation + skip (+ ReLU)
# ---------------------------------------------------------------------------
def _attn_kernel(m_ref, adj_ref, a_dst_ref, a_src_t_ref, h_src_ref, skip_ref,
                 o_ref, l_sc, *, tk, h_resident, apply_relu):
    k = pl.program_id(1)

    @pl.when(k == 0)
    def _():
        l_sc[...] = jnp.zeros_like(l_sc)
        o_ref[...] = jnp.zeros_like(o_ref)      # o block is resident across k

    # logits[i, j] = leaky_relu(a_dst[i] + a_src[j]); M is a static global
    # upper bound, so exp never overflows and no running max / rescale needed.
    z = a_dst_ref[...] + a_src_t_ref[...]                     # [TM, TK] f32
    z = jnp.maximum(z, NEG_SLOPE * z) - m_ref[...]            # leaky_relu - M
    p = adj_ref[...].astype(jnp.float32) * jnp.exp(z)         # 0/1 mask fused

    l_sc[...] += jnp.sum(p, axis=-1, keepdims=True)
    if h_resident:
        h_blk = h_src_ref[pl.ds(pl.multiple_of(k * tk, tk), tk), :]
    else:
        h_blk = h_src_ref[...]
    o_ref[...] += jnp.dot(p.astype(jnp.bfloat16), h_blk,
                          preferred_element_type=jnp.float32)

    @pl.when(k == pl.num_programs(1) - 1)
    def _():
        # normalize after the matmul: O(TM*C) mul + EUP reciprocal instead of
        # an O(TM*TK) divide; isolated (all-masked) rows -> acc == 0.
        inv = pl.reciprocal(jnp.maximum(l_sc[...], 1e-16), approx=True)
        out = o_ref[...] * inv + skip_ref[...].astype(jnp.float32)
        if apply_relu:
            out = jnp.maximum(out, 0.0)
        o_ref[...] = out


# ---------------------------------------------------------------------------
# Wrappers
# ---------------------------------------------------------------------------
def _pack_layer_params(p, f_pad, c_pad):
    # Fold the attention-score dot products into the MXU:
    #   a_src = x @ (w_src @ att_src^T),  a_dst = x @ (w_dst @ att_dst^T)
    v_src = p["w_src"] @ p["att_src"].T            # [f_in, 1]
    v_dst = p["w_dst"] @ p["att_dst"].T            # [f_in, 1]
    score_cols = jnp.concatenate([v_src, v_dst], axis=1)
    w_cat = jnp.concatenate(
        [_pad2(p["w_src"], f_pad, c_pad),
         _pad2(p["w_lin"], f_pad, c_pad),
         _pad2(score_cols, f_pad, 128)], axis=1).astype(jnp.bfloat16)
    bias = _pad2(p["b_conv"] + p["b_lin"], 1, c_pad)
    return w_cat, bias


def gat_layer(x_pad, adj_pad, params, f_pad, c_pad, *, apply_relu):
    """One fused GAT layer on padded inputs: GATConv(x, adj) + Linear(x)."""
    n_pad = x_pad.shape[0]
    w_cat, bias = _pack_layer_params(params, f_pad, c_pad)

    # ---- projections ----
    tr = _pick_tile(n_pad, 256, want_blocks=2)
    h_src, skip, a_src, a_dst = pl.pallas_call(
        functools.partial(_proj_kernel, c_pad=c_pad),
        grid=(n_pad // tr,),
        in_specs=[
            pl.BlockSpec((tr, f_pad), lambda i: (i, 0)),               # x
            pl.BlockSpec((f_pad, 2 * c_pad + 128), lambda i: (0, 0)),  # w_cat
            pl.BlockSpec((1, c_pad), lambda i: (0, 0)),                # bias
        ],
        out_specs=[
            pl.BlockSpec((tr, c_pad), lambda i: (i, 0)),               # h_src
            pl.BlockSpec((tr, c_pad), lambda i: (i, 0)),               # skip
            pl.BlockSpec((tr, 1), lambda i: (i, 0)),                   # a_src
            pl.BlockSpec((tr, 1), lambda i: (i, 0)),                   # a_dst
        ],
        out_shape=(
            jax.ShapeDtypeStruct((n_pad, c_pad), jnp.bfloat16),
            jax.ShapeDtypeStruct((n_pad, c_pad), jnp.bfloat16),
            jax.ShapeDtypeStruct((n_pad, 1), jnp.float32),
            jax.ShapeDtypeStruct((n_pad, 1), jnp.float32),
        ),
        compiler_params=pltpu.CompilerParams(
            dimension_semantics=("parallel",),
            vmem_limit_bytes=32 * 1024 * 1024),
    )(x_pad, w_cat, bias)

    # source scores as a lane-dense row vector (tiny relayout, n_pad floats)
    a_src_t = a_src.reshape(1, n_pad)

    # static softmax shift: global upper bound on leaky_relu(a_dst + a_src)
    z_max = jnp.max(a_dst) + jnp.max(a_src)
    m_stat = jnp.maximum(z_max, NEG_SLOPE * z_max).reshape(1, 1)

    # ---- masked softmax + aggregation + skip ----
    tm = _pick_tile(n_pad, 256, want_blocks=2)   # dst rows per block
    tk = _pick_tile(n_pad, 1024)                 # src cols per block
    h_resident = n_pad * c_pad * 2 <= 4 * 1024 * 1024   # keep h_src in VMEM
    h_spec = (pl.BlockSpec((n_pad, c_pad), lambda i, k: (0, 0)) if h_resident
              else pl.BlockSpec((tk, c_pad), lambda i, k: (k, 0)))

    out = pl.pallas_call(
        functools.partial(_attn_kernel, tk=tk,
                          h_resident=h_resident, apply_relu=apply_relu),
        grid=(n_pad // tm, n_pad // tk),
        in_specs=[
            pl.BlockSpec((1, 1), lambda i, k: (0, 0)),        # m_stat
            pl.BlockSpec((tm, tk), lambda i, k: (i, k)),      # adj (int8)
            pl.BlockSpec((tm, 1), lambda i, k: (i, 0)),       # a_dst
            pl.BlockSpec((1, tk), lambda i, k: (0, k)),       # a_src^T
            h_spec,                                           # h_src (bf16)
            pl.BlockSpec((tm, c_pad), lambda i, k: (i, 0)),   # skip (bf16)
        ],
        out_specs=pl.BlockSpec((tm, c_pad), lambda i, k: (i, 0)),
        out_shape=jax.ShapeDtypeStruct((n_pad, c_pad), jnp.float32),
        scratch_shapes=[pltpu.VMEM((tm, 1), jnp.float32)],    # running denom
        compiler_params=pltpu.CompilerParams(
            dimension_semantics=("parallel", "arbitrary"),
            vmem_limit_bytes=32 * 1024 * 1024),
    )(m_stat, adj_pad, a_dst, a_src_t, h_src, skip)
    return out


def gat_forward(x, adj, p1, p2, *, hidden, out_ch):
    n, f_in = x.shape
    n_pad = _round_up(n, 128)
    f_pad = _round_up(f_in, 128)
    h_pad = _round_up(hidden, 128)
    o_pad = _round_up(out_ch, 128)

    x_pad = _pad2(x.astype(jnp.float32), n_pad, f_pad)
    # one narrow int8 adjacency copy streamed by both layers (dominant N^2 HBM
    # traffic, half the bytes of the previous bf16 version)
    adj_pad = _pad2(adj.astype(jnp.float32), n_pad, n_pad).astype(jnp.int8)

    h = gat_layer(x_pad, adj_pad, p1, f_pad, h_pad, apply_relu=True)
    y = gat_layer(h, adj_pad, p2, h_pad, o_pad, apply_relu=False)
    return y[:n, :out_ch]


# ---------------------------------------------------------------------------
# Graph / parameter helpers + pure-JAX reference
# ---------------------------------------------------------------------------
def edge_index_to_adj(edge_index, num_nodes):
    src, dst = edge_index[0], edge_index[1]
    adj = jnp.zeros((num_nodes, num_nodes), jnp.float32)
    return adj.at[dst, src].set(1.0)


def init_layer_params(keys, f_in, c):
    return dict(
        w_src=0.1 * jax.random.normal(keys[0], (f_in, c), jnp.float32),
        w_dst=0.1 * jax.random.normal(keys[1], (f_in, c), jnp.float32),
        att_src=0.1 * jax.random.normal(keys[2], (1, c), jnp.float32),
        att_dst=0.1 * jax.random.normal(keys[3], (1, c), jnp.float32),
        b_conv=jnp.zeros((1, c), jnp.float32),
        w_lin=0.1 * jax.random.normal(keys[4], (f_in, c), jnp.float32),
        b_lin=0.01 * jnp.ones((1, c), jnp.float32),
    )


def _ref_layer(x, adj, p, apply_relu):
    h_src = x @ p["w_src"]
    h_dst = x @ p["w_dst"]
    a_src = jnp.sum(h_src * p["att_src"], -1, keepdims=True)
    a_dst = jnp.sum(h_dst * p["att_dst"], -1, keepdims=True)
    logits = a_dst + a_src.T
    logits = jnp.where(logits > 0, logits, NEG_SLOPE * logits)
    mask = adj > 0
    masked = jnp.where(mask, logits, NEG_INF)
    m = jnp.max(masked, -1, keepdims=True)
    e = jnp.where(mask, jnp.exp(logits - m), 0.0)
    denom = jnp.maximum(jnp.sum(e, -1, keepdims=True), 1e-16)
    out = (e / denom) @ h_src + p["b_conv"] + x @ p["w_lin"] + p["b_lin"]
    return jnp.maximum(out, 0.0) if apply_relu else out


if __name__ == "__main__":
    N, F_IN, HIDDEN, OUT = 64, 16, 32, 8

    keys = jax.random.split(jax.random.PRNGKey(0), 13)
    x = jax.random.normal(keys[0], (N, F_IN), jnp.float32)

    # small deterministic graph: a ring plus some random edges
    src_ring = jnp.arange(N, dtype=jnp.int32)
    dst_ring = (src_ring + 1) % N
    src_rand = jax.random.randint(keys[1], (64,), 0, N, dtype=jnp.int32)
    dst_rand = jax.random.randint(keys[2], (64,), 0, N, dtype=jnp.int32)
    edge_index = jnp.stack([jnp.concatenate([src_ring, src_rand]),
                            jnp.concatenate([dst_ring, dst_rand])])  # [2, E]
    adj = edge_index_to_adj(edge_index, N)

    p1 = init_layer_params(keys[3:8], F_IN, HIDDEN)
    p2 = init_layer_params(keys[8:13], HIDDEN, OUT)

    y = gat_forward(x, adj, p1, p2, hidden=HIDDEN, out_ch=OUT)
    jax.block_until_ready(y)
    assert y.shape == (N, OUT) and y.dtype == jnp.float32

    # loose check vs an f32 pure-JAX reference (kernel uses bf16 MXU operands)
    y_ref = _ref_layer(_ref_layer(x, adj, p1, True), adj, p2, False)
    max_diff = float(jnp.max(jnp.abs(y - y_ref)))
    assert max_diff < 0.1, f"mismatch vs reference: {max_diff}"

    print("KERNEL_OK")
</pallas_src>

<mosaic_0001>
module attributes {stable_mosaic.version = 11 : i64} {
  func.func @_proj_kernel(%arg0: i32, %arg1: memref<128x128xf32, #tpu.memory_space<vmem>>, %arg2: memref<128x384xbf16, #tpu.memory_space<vmem>>, %arg3: memref<1x128xf32, #tpu.memory_space<vmem>>, %arg4: memref<128x128xbf16, #tpu.memory_space<vmem>>, %arg5: memref<128x128xbf16, #tpu.memory_space<vmem>>, %arg6: memref<128x1xf32, #tpu.memory_space<vmem>>, %arg7: memref<128x1xf32, #tpu.memory_space<vmem>>) attributes {dimension_semantics = [#tpu.dimension_semantics<parallel>], iteration_bounds = array<i64: 1>, scalar_prefetch = 0 : i64, scratch_operands = 0 : i64, tpu.core_type = #tpu.core_type<tc>, window_params = [{transform_indices = @transform_0, window_bounds = array<i64: 128, 128>}, {pipeline_mode = #tpu.pipeline_mode<synchronous>, transform_indices = @transform_1, window_bounds = array<i64: 128, 384>}, {pipeline_mode = #tpu.pipeline_mode<synchronous>, transform_indices = @transform_2, window_bounds = array<i64: 1, 128>}, {transform_indices = @transform_3, window_bounds = array<i64: 128, 128>}, {transform_indices = @transform_4, window_bounds = array<i64: 128, 128>}, {transform_indices = @transform_5, window_bounds = array<i64: 128, 1>}, {transform_indices = @transform_6, window_bounds = array<i64: 128, 1>}]} {
    %c0 = arith.constant 0 : index
    %c0_0 = arith.constant 0 : index
    %0 = vector.load %arg1[%c0, %c0_0] : memref<128x128xf32, #tpu.memory_space<vmem>>, vector<128x128xf32>
    %1 = arith.truncf %0 : vector<128x128xf32> to vector<128x128xbf16>
    %c0_1 = arith.constant 0 : index
    %c0_2 = arith.constant 0 : index
    %2 = vector.load %arg2[%c0_1, %c0_2] : memref<128x384xbf16, #tpu.memory_space<vmem>>, vector<128x384xbf16>
    %cst = arith.constant dense<0.000000e+00> : vector<128x384xf32>
    %3 = tpu.matmul %1, %2, %cst {dimension_numbers = #tpu.dot_dimension_numbers<[1], [0], [0], [1], [0, 0, 1, 1], [], []>} : vector<128x128xbf16>, vector<128x384xbf16>, vector<128x384xf32> -> vector<128x384xf32>
    %4 = vector.extract_strided_slice %3 {offsets = [0, 0], sizes = [128, 128], strides = [1, 1]} : vector<128x384xf32> to vector<128x128xf32>
    %5 = arith.truncf %4 : vector<128x128xf32> to vector<128x128xbf16>
    %c0_3 = arith.constant 0 : index
    %c0_4 = arith.constant 0 : index
    %6 = vector.load %arg4[%c0_3, %c0_4] : memref<128x128xbf16, #tpu.memory_space<vmem>>, vector<128x128xbf16>
    tpu.vector_store %arg4[%c0_3, %c0_4], %5 {strides = array<i32>} : memref<128x128xbf16, #tpu.memory_space<vmem>>, vector<128x128xbf16>,
    %7 = vector.extract_strided_slice %3 {offsets = [0, 128], sizes = [128, 128], strides = [1, 1]} : vector<128x384xf32> to vector<128x128xf32>
    %c0_5 = arith.constant 0 : index
    %c0_6 = arith.constant 0 : index
    %8 = vector.load %arg3[%c0_5, %c0_6] : memref<1x128xf32, #tpu.memory_space<vmem>>, vector<1x128xf32>
    %9 = vector.broadcast %8 : vector<1x128xf32> to vector<128x128xf32>
    %10 = arith.addf %7, %9 : vector<128x128xf32>
    %11 = arith.truncf %10 : vector<128x128xf32> to vector<128x128xbf16>
    %c0_7 = arith.constant 0 : index
    %c0_8 = arith.constant 0 : index
    %12 = vector.load %arg5[%c0_7, %c0_8] : memref<128x128xbf16, #tpu.memory_space<vmem>>, vector<128x128xbf16>
    tpu.vector_store %arg5[%c0_7, %c0_8], %11 {strides = array<i32>} : memref<128x128xbf16, #tpu.memory_space<vmem>>, vector<128x128xbf16>,
    %13 = vector.extract_strided_slice %3 {offsets = [0, 256], sizes = [128, 1], strides = [1, 1]} : vector<128x384xf32> to vector<128x1xf32>
    %c0_9 = arith.constant 0 : index
    %c0_10 = arith.constant 0 : index
    %14 = vector.load %arg6[%c0_9, %c0_10] : memref<128x1xf32, #tpu.memory_space<vmem>>, vector<128x1xf32>
    tpu.vector_store %arg6[%c0_9, %c0_10], %13 {strides = array<i32>} : memref<128x1xf32, #tpu.memory_space<vmem>>, vector<128x1xf32>,
    %15 = vector.extract_strided_slice %3 {offsets = [0, 257], sizes = [128, 1], strides = [1, 1]} : vector<128x384xf32> to vector<128x1xf32>
    %c0_11 = arith.constant 0 : index
    %c0_12 = arith.constant 0 : index
    %16 = vector.load %arg7[%c0_11, %c0_12] : memref<128x1xf32, #tpu.memory_space<vmem>>, vector<128x1xf32>
    tpu.vector_store %arg7[%c0_11, %c0_12], %15 {strides = array<i32>} : memref<128x1xf32, #tpu.memory_space<vmem>>, vector<128x1xf32>,
    return
  }
  func.func @transform_0(%arg0: i32) -> (i32, i32) {
    %c0_i32 = arith.constant 0 : i32
    %c0_i32_0 = arith.constant 0 : i32
    return %arg0, %c0_i32 : i32, i32
  }
  func.func @transform_1(%arg0: i32) -> (i32, i32) {
    %c0_i32 = arith.constant 0 : i32
    %c0_i32_0 = arith.constant 0 : i32
    %c0_i32_1 = arith.constant 0 : i32
    return %c0_i32, %c0_i32_0 : i32, i32
  }
  func.func @transform_2(%arg0: i32) -> (i32, i32) {
    %c0_i32 = arith.constant 0 : i32
    %c0_i32_0 = arith.constant 0 : i32
    %c0_i32_1 = arith.constant 0 : i32
    return %c0_i32, %c0_i32_0 : i32, i32
  }
  func.func @transform_3(%arg0: i32) -> (i32, i32) {
    %c0_i32 = arith.constant 0 : i32
    %c0_i32_0 = arith.constant 0 : i32
    return %arg0, %c0_i32 : i32, i32
  }
  func.func @transform_4(%arg0: i32) -> (i32, i32) {
    %c0_i32 = arith.constant 0 : i32
    %c0_i32_0 = arith.constant 0 : i32
    return %arg0, %c0_i32 : i32, i32
  }
  func.func @transform_5(%arg0: i32) -> (i32, i32) {
    %c0_i32 = arith.constant 0 : i32
    %c0_i32_0 = arith.constant 0 : i32
    return %arg0, %c0_i32 : i32, i32
  }
  func.func @transform_6(%arg0: i32) -> (i32, i32) {
    %c0_i32 = arith.constant 0 : i32
    %c0_i32_0 = arith.constant 0 : i32
    return %arg0, %c0_i32 : i32, i32
  }
}

</mosaic_0001>

<bundles_post_ra>
// kernel: tpu_custom_call.1
= control target key start
LH: loop header
LB: loop body
LE: loop exit
PB: predicated region body
PF: predicated region fallthrough
CT: control target
= control target key end

     0   :  { %12 = vsyncpa [#allocation3], 0  ;;  %s1224_s0 = inlined_call_operand.hbm [shape: f32[128,128], index: 0, kind: input, shape index: {}]   ;;  %s1225_s1 = inlined_call_operand.hbm [shape: bf16[128,384], index: 1, kind: input, shape index: {}]   ;;  %s1226_s2 = inlined_call_operand.vmem [shape: f32[1,128], index: 2, kind: input, shape index: {}]   ;;  %s1227_s3 = inlined_call_operand.hbm [shape: bf16[128,128], index: 3, kind: output, shape index: {0}]   ;;  %s1228_s4 = inlined_call_operand.hbm [shape: bf16[128,128], index: 4, kind: output, shape index: {1}]   ;;  %s1229_s5 = inlined_call_operand.vmem [shape: f32[128,1], index: 5, kind: output, shape index: {2}]   ;;  %s1230_s6 = inlined_call_operand.vmem [shape: f32[128,1], index: 6, kind: output, shape index: {3}]  }
   0x1   :  { %13 = vsyncpa [#allocation6], 0 }
   0x2   :  { %14 = vsyncpa [#allocation4], 0 }
   0x3   :  { %15 = vsyncpa [#allocation9], 0  ;;  %s20_s23 = sshll.u32 %s1224_s0, 4  ;;  %s964_s24 = smov [#allocation2]   ;;  %s21_s23 = int_to_ptr.hbm [resolvable:$true] %s20_s23 }
   0x4   :  { %s22_s25 = sshll.u32 %s964_s24, 4  ;;  %s33_s28 = sshll.u32 %s1225_s1, 4  ;;  %s23_s25 = int_to_ptr.vmem [resolvable:$true] %s22_s25  ;;  %s34_s28 = int_to_ptr.hbm [resolvable:$true] %s33_s28 }
   0x5   :  { %s965_s29 = smov 128   ;;  %s966_s30 = smov 8  }
   0x6   :  { %28 = dma.hbm_to_vmem [thread:$0]  %s21_s23, 2048, %s23_s25, [#allocation3], %s965_s29, %s965_s29, %s966_s30  }
   0x7   :  { %s967_s7 = smov [#allocation5]   ;;  %s968_s9 = smov 192  }
   0x8   :  { %s35_s8 = sshll.u32 %s967_s7, 4  ;;  %s969_s10 = smov 12   ;;  %s36_s8 = int_to_ptr.vmem [resolvable:$true] %s35_s8 }
   0x9   :  { %41 = dma.hbm_to_vmem [thread:$0]  %s34_s28, 3072, %s36_s8, [#allocation6], %s968_s9, %s968_s9, %s969_s10  }
   0xa   :  { %956 = dma.done.wait [#allocation3], 2048  }
   0xb   :  { %957 = vsyncadd [#allocation3], 4294965248 }
   0xc   :  { %958 = dma.done.wait [#allocation6], 3072  }
   0xd   :  { %959 = vsyncadd [#allocation6], 4294964224  ;;  %v696_v0 = vld [vmem:[#allocation5 + $0xa8] sm:$0xf]  ;;  %v728_v1 = vld [vmem:[#allocation5 + $0xb0] sm:$0xf0] }
   0xe   :  { %v704_v2 = vld [vmem:[#allocation5 + $0xb0] sm:$0xf]  ;;  %v697_v3 = vor.u32 %v728_v1, %v696_v0  ;;  %v729_v4 = vld [vmem:[#allocation5 + $0xb8] sm:$0xf0]  ;;  %v692_v8 = vld [vmem:[#allocation5 + $0x98] sm:$0xf] }
   0xf   :  { %v684_v5 = vld [vmem:[#allocation5 + $0x90] sm:$0xf]  ;;  %v725_v6 = vld [vmem:[#allocation5 + $0x98] sm:$0xf0]  ;;  %v1016_v7 = vor.u32 %v729_v4, %v704_v2  ;;  %v726_v9 = vld [vmem:[#allocation5 + $0xa0] sm:$0xf0] }
  0x10   :  { %824 = vmatpush.bf16.msra.mxu3 %v697_v3  ;;  %v685_v10 = vor.u32 %v725_v6, %v684_v5  ;;  %236 = vmatpush.bf16.msra.mxu0 %v697_v3  ;;  %v1019_v11 = vor.u32 %v726_v9, %v692_v8  ;;  %v672_v12 = vld [vmem:[#allocation5 + $0x78] sm:$0xf]  ;;  %v722_v13 = vld [vmem:[#allocation5 + $0x80] sm:$0xf0]  ;;  %v680_v14 = vld [vmem:[#allocation5 + $0x80] sm:$0xf] }
  0x11   :  { %334 = vmatpush.bf16.msra.mxu2 %v1016_v7  ;;  %v723_v15 = vld [vmem:[#allocation5 + $0x88] sm:$0xf0]  ;;  %v673_v16 = vor.u32 %v722_v13, %v672_v12  ;;  %v660_v18 = vld [vmem:[#allocation5 + $0x60] sm:$0xf]  ;;  %v668_v20 = vld [vmem:[#allocation5 + $0x68] sm:$0xf] }
  0x12   :  { %v1022_v17 = vor.u32 %v723_v15, %v680_v14  ;;  %v719_v19 = vld [vmem:[#allocation5 + $0x68] sm:$0xf0]  ;;  %v720_v21 = vld [vmem:[#allocation5 + $0x70] sm:$0xf0]  ;;  %v698_v24 = vld [vmem:[#allocation5 + $0xb4] sm:$0xf0] }
  0x13   :  { %v661_v22 = vor.u32 %v719_v19, %v660_v18  ;;  %v727_v23 = vld [vmem:[#allocation5 + $0xac] sm:$0xf]  ;;  %v1025_v25 = vor.u32 %v720_v21, %v668_v20  ;;  %v648_v26 = vld [vmem:[#allocation5 + $0x48] sm:$0xf]  ;;  %v716_v27 = vld [vmem:[#allocation5 + $0x50] sm:$0xf0] }
  0x14   :  { %825 = vmatpush.bf16.msra.mxu3 %v685_v10  ;;  %237 = vmatpush.bf16.msra.mxu0 %v685_v10  ;;  %v656_v28 = vld [vmem:[#allocation5 + $0x50] sm:$0xf]  ;;  %v701_v29 = vor.u32 %v727_v23, %v698_v24  ;;  %v717_v30 = vld [vmem:[#allocation5 + $0x58] sm:$0xf0]  ;;  %v724_v31 = vld [vmem:[#allocation5 + $0x94] sm:$0xf]  ;;  %v649_v33 = vor.u32 %v716_v27, %v648_v26 }
  0x15   :  { %335 = vmatpush.bf16.msra.mxu2 %v1019_v11  ;;  %v686_v32 = vld [vmem:[#allocation5 + $0x9c] sm:$0xf0]  ;;  %v1028_v34 = vor.u32 %v717_v30, %v656_v28  ;;  %v636_v35 = vld [vmem:[#allocation5 + $0x30] sm:$0xf]  ;;  %v713_v36 = vld [vmem:[#allocation5 + $0x38] sm:$0xf0] }
  0x16   :  { %285 = vmatpush.bf16.msra.mxu1 %v701_v29  ;;  %v644_v37 = vld [vmem:[#allocation5 + $0x38] sm:$0xf]  ;;  %v689_v38 = vor.u32 %v724_v31, %v686_v32  ;;  %v714_v39 = vld [vmem:[#allocation5 + $0x40] sm:$0xf0]  ;;  %v721_v40 = vld [vmem:[#allocation5 + $0x7c] sm:$0xf]  ;;  %v637_v42 = vor.u32 %v713_v36, %v636_v35 }
  0x17   :  { %v674_v41 = vld [vmem:[#allocation5 + $0x84] sm:$0xf0]  ;;  %v1031_v43 = vor.u32 %v714_v39, %v644_v37  ;;  %v624_v44 = vld [vmem:[#allocation5 + $0x18] sm:$0xf]  ;;  %v710_v45 = vld [vmem:[#allocation5 + $0x20] sm:$0xf0] }
  0x18   :  { %826 = vmatpush.bf16.msra.mxu3 %v673_v16  ;;  %238 = vmatpush.bf16.msra.mxu0 %v673_v16  ;;  %v632_v46 = vld [vmem:[#allocation5 + $0x20] sm:$0xf]  ;;  %v677_v47 = vor.u32 %v721_v40, %v674_v41  ;;  %v711_v48 = vld [vmem:[#allocation5 + $0x28] sm:$0xf0]  ;;  %v718_v49 = vld [vmem:[#allocation5 + $0x64] sm:$0xf]  ;;  %v625_v51 = vor.u32 %v710_v45, %v624_v44 }
  0x19   :  { %336 = vmatpush.bf16.msra.mxu2 %v1022_v17  ;;  %v662_v50 = vld [vmem:[#allocation5 + $0x6c] sm:$0xf0]  ;;  %v1034_v52 = vor.u32 %v711_v48, %v632_v46  ;;  %v612_v53 = vld [vmem:[#allocation5] sm:$0xf]  ;;  %v707_v54 = vld [vmem:[#allocation5 + $0x8] sm:$0xf0] }
  0x1a   :  { %286 = vmatpush.bf16.msra.mxu1 %v689_v38  ;;  %v620_v55 = vld [vmem:[#allocation5 + $0x8] sm:$0xf]  ;;  %v665_v56 = vor.u32 %v718_v49, %v662_v50  ;;  %v708_v57 = vld [vmem:[#allocation5 + $0x10] sm:$0xf0]  ;;  %v715_v58 = vld [vmem:[#allocation5 + $0x4c] sm:$0xf]  ;;  %v613_v60 = vor.u32 %v707_v54, %v612_v53 }
  0x1b   :  { %v650_v59 = vld [vmem:[#allocation5 + $0x54] sm:$0xf0]  ;;  %v64_v61 = vld [vmem:[#allocation2 + $0x60] sm:$0xff]  ;;  %v65_v62 = vld [vmem:[#allocation2 + $0x68] sm:$0xff]  ;;  %v1037_v63 = vor.u32 %v708_v57, %v620_v55  ;;  %vm467_vm0 = vcmask 7168   ;;  %s970_s11 = smov 127  }
  0x1c   :  { %827 = vmatpush.bf16.msra.mxu3 %v661_v22  ;;  %239 = vmatpush.bf16.msra.mxu0 %v661_v22  ;;  %v52_v0 = vld [vmem:[#allocation2] sm:$0xff]  ;;  %v53_v1 = vld [vmem:[#allocation2 + $0x8] sm:$0xff]  ;;  %v653_v2 = vor.u32 %v715_v58, %v650_v59  ;;  %v712_v3 = vld [vmem:[#allocation5 + $0x34] sm:$0xf]  ;;  %v1039_v5 = vpack.c.bf16 %v65_v62, %v64_v61  ;;  %s971_s27 = smov [#allocation7]   ;;  %s570_s7 = sshll.u32 %s1227_s3, 4  ;;  %s571_s7 = int_to_ptr.hbm [resolvable:$true] %s570_s7 }
  0x1d   :  { %337 = vmatpush.bf16.msra.mxu2 %v1025_v25  ;;  %v638_v4 = vld [vmem:[#allocation5 + $0x3c] sm:$0xf0]  ;;  %v68_v6 = vpack.c.bf16 %v53_v1, %v52_v0  ;;  %v709_v9 = vld [vmem:[#allocation5 + $0x1c] sm:$0xf]  ;;  %v626_v10 = vld [vmem:[#allocation5 + $0x24] sm:$0xf0] }
  0x1e   :  { %287 = vmatpush.bf16.msra.mxu1 %v677_v47  ;;  %v641_v8 = vor.u32 %v712_v3, %v638_v4  ;;  %v629_v12 = vor.u32 %v709_v9, %v626_v10  ;;  %v706_v13 = vld [vmem:[#allocation5 + $0x4] sm:$0xf]  ;;  %v614_v14 = vld [vmem:[#allocation5 + $0xc] sm:$0xf0]  ;;  %v67_v18 = vld [vmem:[#allocation2 + $0x78] sm:$0xff]  ;;  %s568_s28 = sshll.u32 %s971_s27, 4  ;;  %s569_s28 = int_to_ptr.vmem [resolvable:$true] %s568_s28 }
  0x1f   :  { %v617_v15 = vor.u32 %v706_v13, %v614_v14  ;;  %v66_v16 = vld [vmem:[#allocation2 + $0x70] sm:$0xff]  ;;  %v55_v20 = vld [vmem:[#allocation2 + $0x18] sm:$0xff]  ;;  %v56_v23 = vld [vmem:[#allocation2 + $0x20] sm:$0xff]  ;;  %s972_s10 = smov [#allocation8]   ;;  %s583_s13 = sshll.u32 %s1228_s4, 4  ;;  %s584_s13 = int_to_ptr.hbm [resolvable:$true] %s583_s13 }
  0x20   :  { %828 = vmatpush.bf16.msra.mxu3 %v649_v33  ;;  %240 = vmatpush.bf16.msra.mxu0 %v649_v33  ;;  %v54_v19 = vld [vmem:[#allocation2 + $0x10] sm:$0xff]  ;;  %v75_v21 = vpack.c.bf16 %v67_v18, %v66_v16  ;;  %v57_v24 = vld [vmem:[#allocation2 + $0x28] sm:$0xff]  ;;  %v59_v28 = vld [vmem:[#allocation2 + $0x38] sm:$0xff]  ;;  %s581_s0 = sshll.u32 %s972_s10, 4  ;;  %s973_s3 = smov 64   ;;  %s582_s0 = int_to_ptr.vmem [resolvable:$true] %s581_s0 }
  0x21   :  { %338 = vmatpush.bf16.msra.mxu2 %v1028_v34  ;;  %v69_v22 = vpack.c.bf16 %v55_v20, %v54_v19  ;;  %v70_v26 = vpack.c.bf16 %v57_v24, %v56_v23  ;;  %v58_v27 = vld [vmem:[#allocation2 + $0x30] sm:$0xff]  ;;  %v63_v30 = vld [vmem:[#allocation2 + $0x58] sm:$0xff]  ;;  %v1081_v44 = vld [vmem:[%s1226_s2] ss:$0 sm:$0xff]  ;;  %s974_s14 = smov 4  }
  0x22   :  { %288 = vmatpush.bf16.msra.mxu1 %v665_v56 }
  0x24   :  { %829 = vmatpush.bf16.msra.mxu3 %v637_v42  ;;  %241 = vmatpush.bf16.msra.mxu0 %v637_v42 }
  0x25   :  { %339 = vmatpush.bf16.msra.mxu2 %v1031_v43 }
  0x26   :  { %289 = vmatpush.bf16.msra.mxu1 %v653_v2 }
  0x28   :  { %830 = vmatpush.bf16.msra.mxu3 %v625_v51  ;;  %242 = vmatpush.bf16.msra.mxu0 %v625_v51 }
  0x29   :  { %340 = vmatpush.bf16.msra.mxu2 %v1034_v52 }
  0x2a   :  { %290 = vmatpush.bf16.msra.mxu1 %v641_v8 }
  0x2c   :  { %831 = vmatpush.bf16.msra.mxu3 %v613_v60  ;;  %243 = vmatpush.bf16.msra.mxu0 %v613_v60 }
  0x2d   :  { %341 = vmatpush.bf16.msra.mxu2 %v1037_v63 }
  0x2e   :  { %291 = vmatpush.bf16.msra.mxu1 %v629_v12 }
  0x2f   :  { %274 = vmatmul.bf16.vlgmr.msra.gmra.mxu3 %v1039_v5  ;;  %244 = vmatmul.bf16.vlgmr.msra.gmra.mxu0 %v68_v6 }
  0x30   :  { %832 = vmatpush.bf16.msrb.mxu3 %v701_v29  ;;  %342 = vmatmul.bf16.vlgmr.msra.gmra.mxu2 %v68_v6  ;;  %v71_v29 = vpack.c.bf16 %v59_v28, %v58_v27 }
  0x32   :  { %292 = vmatpush.bf16.msra.mxu1 %v617_v15 }
  0x34   :  { %833 = vmatpush.bf16.msrb.mxu3 %v689_v38 }
  0x35   :  { %293 = vmatmul.bf16.vlgmr.msra.gmra.mxu1 %v68_v6 }
  0x38   :  { %834 = vmatpush.bf16.msrb.mxu3 %v677_v47 }
  0x3c   :  { %835 = vmatpush.bf16.msrb.mxu3 %v665_v56 }
  0x3f   :  { %279 = vmatmul.bf16.gmra.mxu3 %v75_v21  ;;  %249 = vmatmul.bf16.gmra.mxu0 %v69_v22 }
  0x40   :  { %836 = vmatpush.bf16.msrb.mxu3 %v653_v2  ;;  %347 = vmatmul.bf16.gmra.mxu2 %v69_v22 }
  0x44   :  { %837 = vmatpush.bf16.msrb.mxu3 %v641_v8 }
  0x45   :  { %298 = vmatmul.bf16.gmra.mxu1 %v69_v22 }
  0x48   :  { %838 = vmatpush.bf16.msrb.mxu3 %v629_v12 }
  0x4c   :  { %839 = vmatpush.bf16.msrb.mxu3 %v617_v15 }
  0x4f   :  { %323 = vmatmul.bf16.vlgmr.msrb.gmra.mxu3 %v1039_v5  ;;  %254 = vmatmul.bf16.gmra.mxu0 %v70_v26 }
  0x50   :  { %840 = vmatpush.bf16.msra.mxu3 %v1016_v7  ;;  %352 = vmatmul.bf16.gmra.mxu2 %v70_v26  ;;  %v60_v7 = vld [vmem:[#allocation2 + $0x40] sm:$0xff] }
  0x54   :  { %841 = vmatpush.bf16.msra.mxu3 %v1019_v11  ;;  %v61_v11 = vld [vmem:[#allocation2 + $0x48] sm:$0xff] }
  0x55   :  { %303 = vmatmul.bf16.gmra.mxu1 %v70_v26 }
  0x58   :  { %842 = vmatpush.bf16.msra.mxu3 %v1022_v17  ;;  %v72_v17 = vpack.c.bf16 %v61_v11, %v60_v7 }
  0x5c   :  { %843 = vmatpush.bf16.msra.mxu3 %v1025_v25  ;;  %v62_v25 = vld [vmem:[#allocation2 + $0x50] sm:$0xff] }
  0x5d   :  { %v73_v31 = vpack.c.bf16 %v63_v30, %v62_v25 }
  0x5f   :  { %328 = vmatmul.bf16.gmra.mxu3 %v75_v21  ;;  %259 = vmatmul.bf16.gmra.mxu0 %v71_v29 }
  0x60   :  { %844 = vmatpush.bf16.msra.mxu3 %v1028_v34  ;;  %357 = vmatmul.bf16.gmra.mxu2 %v71_v29 }
  0x64   :  { %845 = vmatpush.bf16.msra.mxu3 %v1031_v43 }
  0x65   :  { %308 = vmatmul.bf16.gmra.mxu1 %v71_v29 }
  0x68   :  { %846 = vmatpush.bf16.msra.mxu3 %v1034_v52 }
  0x6c   :  { %847 = vmatpush.bf16.msra.mxu3 %v1037_v63 }
  0x6f   :  { %372 = vmatmul.bf16.vlgmr.msra.gmra.mxu3 %v1039_v5  ;;  %264 = vmatmul.bf16.gmra.mxu0 %v72_v17 }
  0x70   :  { %362 = vmatmul.bf16.gmra.mxu2 %v72_v17 }
  0x75   :  { %313 = vmatmul.bf16.gmra.mxu1 %v72_v17 }
  0x7f   :  { %377 = vmatmul.bf16.gmra.mxu3 %v75_v21  ;;  %269 = vmatmul.bf16.gmra.mxu0 %v73_v31 }
  0x80   :  { %367 = vmatmul.bf16.gmra.mxu2 %v73_v31 }
  0x85   :  { %318 = vmatmul.bf16.gmra.mxu1 %v73_v31 }
  0xac   :  { %v245_v60 = vpop.f32.mrf.mxu0 }
  0xb2   :  { %v275_v32 = vpop.f32.mrf.mxu3  ;;  %v294_v59 = vpop.f32.mrf.mxu1 }
  0xb3   :  { %v343_v33 = vpop.f32.mrf.mxu2  ;;  %v419_v63 = vadd.f32 %v1081_v44, %v294_v59 }
  0xb4   :  { %468 = vst.msk [vmem:[%s1229_s5] sm:$0xff] %vm467_vm0, %v343_v33  ;;  %500 = vrot.lane.b32.xlu0 %v343_v33, %s970_s11  ;;  %v247_v1 = vpop.f32.mrf.mxu0 }
  0xb5   :  { %v733_v3 = vpack.c.bf16 %v247_v1, %v245_v60 }
  0xb7   :  { %734 = vst [vmem:[#allocation7] sm:$0xff] %v733_v3  }
  0xba   :  { %v277_v34 = vpop.f32.mrf.mxu3  ;;  %v296_v0 = vpop.f32.mrf.mxu1 }
  0xbb   :  { %v763_v35 = vpack.c.bf16 %v277_v34, %v275_v32  ;;  %v345_v36 = vpop.f32.mrf.mxu2  ;;  %v420_v2 = vadd.f32 %v1081_v44, %v296_v0 }
  0xbc   :  { %469 = vst.msk [vmem:[%s1229_s5 + $0x8] sm:$0xff] %vm467_vm0, %v345_v36  ;;  %502 = vrot.lane.b32.xlu0 %v345_v36, %s970_s11  ;;  %v250_v9 = vpop.f32.mrf.mxu0 }
  0xbd   :  { %815 = vst [vmem:[#allocation7 + $0x30] sm:$0xff] %v763_v35   ;;  %v773_v4 = vpack.c.bf16 %v420_v2, %v419_v63 }
  0xbf   :  { %774 = vst [vmem:[#allocation8] sm:$0xff] %v773_v4  }
  0xc2   :  { %v280_v37 = vpop.f32.mrf.mxu3  ;;  %v299_v8 = vpop.f32.mrf.mxu1 }
  0xc3   :  { %v348_v38 = vpop.f32.mrf.mxu2  ;;  %v421_v13 = vadd.f32 %v1081_v44, %v299_v8 }
  0xc4   :  { %470 = vst.msk [vmem:[%s1229_s5 + $0x10] sm:$0xff] %vm467_vm0, %v348_v38  ;;  %504 = vrot.lane.b32.xlu1 %v348_v38, %s970_s11  ;;  %v252_v15 = vpop.f32.mrf.mxu0 }
  0xc5   :  { %v738_v18 = vpack.c.bf16 %v252_v15, %v250_v9 }
  0xc7   :  { %810 = vst [vmem:[#allocation7 + $0x8] sm:$0xff] %v738_v18  }
  0xca   :  { %v282_v39 = vpop.f32.mrf.mxu3  ;;  %v301_v14 = vpop.f32.mrf.mxu1 }
  0xcb   :  { %v768_v40 = vpack.c.bf16 %v282_v39, %v280_v37  ;;  %v350_v41 = vpop.f32.mrf.mxu2  ;;  %v422_v16 = vadd.f32 %v1081_v44, %v301_v14 }
  0xcc   :  { %471 = vst.msk [vmem:[%s1229_s5 + $0x18] sm:$0xff] %vm467_vm0, %v350_v41  ;;  %506 = vrot.lane.b32.xlu1 %v350_v41, %s970_s11  ;;  %v255_v21 = vpop.f32.mrf.mxu0 }
  0xcd   :  { %816 = vst [vmem:[#allocation7 + $0x38] sm:$0xff] %v768_v40   ;;  %v778_v19 = vpack.c.bf16 %v422_v16, %v421_v13 }
  0xcf   :  { %817 = vst [vmem:[#allocation8 + $0x8] sm:$0xff] %v778_v19  }
  0xd2   :  { %v324_v42 = vpop.f32.mrf.mxu3  ;;  %v304_v20 = vpop.f32.mrf.mxu1 }
  0xd3   :  { %v353_v43 = vpop.f32.mrf.mxu2  ;;  %v431_v46 = vadd.f32 %v1081_v44, %v324_v42  ;;  %v423_v22 = vadd.f32 %v1081_v44, %v304_v20 }
  0xd4   :  { %472 = vst.msk [vmem:[%s1229_s5 + $0x20] sm:$0xff] %vm467_vm0, %v353_v43  ;;  %508 = vrot.lane.b32.xlu2 %v353_v43, %s970_s11  ;;  %v257_v24 = vpop.f32.mrf.mxu0 }
  0xd5   :  { %v743_v27 = vpack.c.bf16 %v257_v24, %v255_v21 }
  0xd7   :  { %811 = vst [vmem:[#allocation7 + $0x10] sm:$0xff] %v743_v27  }
  0xda   :  { %v326_v45 = vpop.f32.mrf.mxu3  ;;  %v306_v23 = vpop.f32.mrf.mxu1 }
  0xdb   :  { %v432_v47 = vadd.f32 %v1081_v44, %v326_v45  ;;  %v355_v48 = vpop.f32.mrf.mxu2  ;;  %v424_v26 = vadd.f32 %v1081_v44, %v306_v23 }
  0xdc   :  { %473 = vst.msk [vmem:[%s1229_s5 + $0x28] sm:$0xff] %vm467_vm0, %v355_v48  ;;  %510 = vrot.lane.b32.xlu2 %v355_v48, %s970_s11  ;;  %v260_v11 = vpop.f32.mrf.mxu0 }
  0xdd   :  { %v803_v49 = vpack.c.bf16 %v432_v47, %v431_v46  ;;  %v783_v28 = vpack.c.bf16 %v424_v26, %v423_v22 }
  0xdf   :  { %822 = vst [vmem:[#allocation8 + $0x30] sm:$0xff] %v803_v49  }
  0xe0   :  { %818 = vst [vmem:[#allocation8 + $0x10] sm:$0xff] %v783_v28  }
  0xe2   :  { %v329_v50 = vpop.f32.mrf.mxu3  ;;  %v309_v7 = vpop.f32.mrf.mxu1 }
  0xe3   :  { %v358_v51 = vpop.f32.mrf.mxu2  ;;  %v433_v53 = vadd.f32 %v1081_v44, %v329_v50  ;;  %v425_v30 = vadd.f32 %v1081_v44, %v309_v7 }
  0xe4   :  { %474 = vst.msk [vmem:[%s1229_s5 + $0x30] sm:$0xff] %vm467_vm0, %v358_v51  ;;  %512 = vrot.lane.b32.xlu0 %v358_v51, %s970_s11  ;;  %v262_v32 = vpop.f32.mrf.mxu0 }
  0xe5   :  { %v748_v34 = vpack.c.bf16 %v262_v32, %v260_v11 }
  0xe7   :  { %812 = vst [vmem:[#allocation7 + $0x18] sm:$0xff] %v748_v34  }
  0xea   :  { %v331_v52 = vpop.f32.mrf.mxu3  ;;  %v311_v31 = vpop.f32.mrf.mxu1 }
  0xeb   :  { %v434_v54 = vadd.f32 %v1081_v44, %v331_v52  ;;  %v360_v55 = vpop.f32.mrf.mxu2  ;;  %v426_v33 = vadd.f32 %v1081_v44, %v311_v31 }
  0xec   :  { %475 = vst.msk [vmem:[%s1229_s5 + $0x38] sm:$0xff] %vm467_vm0, %v360_v55  ;;  %514 = vrot.lane.b32.xlu1 %v360_v55, %s970_s11  ;;  %v265_v39 = vpop.f32.mrf.mxu0 }
  0xed   :  { %v808_v56 = vpack.c.bf16 %v434_v54, %v433_v53  ;;  %v788_v35 = vpack.c.bf16 %v426_v33, %v425_v30 }
  0xef   :  { %823 = vst [vmem:[#allocation8 + $0x38] sm:$0xff] %v808_v56  }
  0xf0   :  { %819 = vst [vmem:[#allocation8 + $0x18] sm:$0xff] %v788_v35  }
  0xf2   :  { %v373_v57 = vpop.f32.mrf.mxu3  ;;  %v314_v38 = vpop.f32.mrf.mxu1 }
  0xf3   :  { %v363_v58 = vpop.f32.mrf.mxu2  ;;  %480 = vst.msk [vmem:[%s1229_s5 + $0x60] sm:$0xff] %vm467_vm0, %v373_v57  ;;  %524 = vrot.lane.b32.xlu0 %v373_v57, %s970_s11  ;;  %v427_v41 = vadd.f32 %v1081_v44, %v314_v38 }
  0xf4   :  { %476 = vst.msk [vmem:[%s1229_s5 + $0x40] sm:$0xff] %vm467_vm0, %v363_v58  ;;  %516 = vrot.lane.b32.xlu2 %v363_v58, %s970_s11  ;;  %v267_v43 = vpop.f32.mrf.mxu0 }
  0xf5   :  { %v753_v46 = vpack.c.bf16 %v267_v43, %v265_v39 }
  0xf7   :  { %813 = vst [vmem:[#allocation7 + $0x20] sm:$0xff] %v753_v46  }
  0xfa   :  { %v375_v61 = vpop.f32.mrf.mxu3  ;;  %v316_v42 = vpop.f32.mrf.mxu1 }
  0xfb   :  { %v365_v62 = vpop.f32.mrf.mxu2  ;;  %481 = vst.msk [vmem:[%s1229_s5 + $0x68] sm:$0xff] %vm467_vm0, %v375_v61  ;;  %v428_v45 = vadd.f32 %v1081_v44, %v316_v42 }
  0xfc   :  { %477 = vst.msk [vmem:[%s1229_s5 + $0x48] sm:$0xff] %vm467_vm0, %v365_v62  ;;  %518 = vrot.lane.b32.xlu0 %v365_v62, %s970_s11  ;;  %v270_v49 = vpop.f32.mrf.mxu0 }
  0xfd   :  { %v793_v47 = vpack.c.bf16 %v428_v45, %v427_v41 }
  0xff   :  { %820 = vst [vmem:[#allocation8 + $0x20] sm:$0xff] %v793_v47  }
 0x102   :  { %v378_v5 = vpop.f32.mrf.mxu3  ;;  %v319_v48 = vpop.f32.mrf.mxu1 }
 0x103   :  { %v368_v6 = vpop.f32.mrf.mxu2  ;;  %482 = vst.msk [vmem:[%s1229_s5 + $0x70] sm:$0xff] %vm467_vm0, %v378_v5  ;;  %v429_v51 = vadd.f32 %v1081_v44, %v319_v48 }
 0x104   :  { %478 = vst.msk [vmem:[%s1229_s5 + $0x50] sm:$0xff] %vm467_vm0, %v368_v6  ;;  %520 = vrot.lane.b32.xlu1 %v368_v6, %s970_s11  ;;  %v272_v53 = vpop.f32.mrf.mxu0 }
 0x105   :  { %v758_v55 = vpack.c.bf16 %v272_v53, %v270_v49 }
 0x107   :  { %814 = vst [vmem:[#allocation7 + $0x28] sm:$0xff] %v758_v55  }
 0x108   :  { %576 = dma.vmem_to_hbm [thread:$0]  %s569_s28, 1024, %s571_s7, [#allocation4], %s973_s3, %s973_s3, %s974_s14  }
 0x10a   :  { %v380_v10 = vpop.f32.mrf.mxu3  ;;  %v321_v52 = vpop.f32.mrf.mxu1 }
 0x10b   :  { %v370_v12 = vpop.f32.mrf.mxu2  ;;  %483 = vst.msk [vmem:[%s1229_s5 + $0x78] sm:$0xff] %vm467_vm0, %v380_v10  ;;  %530 = vrot.lane.b32.xlu0 %v380_v10, %s970_s11  ;;  %v430_v54 = vadd.f32 %v1081_v44, %v321_v52 }
 0x10c   :  { %479 = vst.msk [vmem:[%s1229_s5 + $0x58] sm:$0xff] %vm467_vm0, %v370_v12  ;;  %526 = vrot.lane.b32.xlu1 %v375_v61, %s970_s11  ;;  %522 = vrot.lane.b32.xlu2 %v370_v12, %s970_s11 }
 0x10d   :  { %v798_v56 = vpack.c.bf16 %v430_v54, %v429_v51 }
 0x10f   :  { %821 = vst [vmem:[#allocation8 + $0x28] sm:$0xff] %v798_v56  }
 0x110   :  { %589 = dma.vmem_to_hbm [thread:$0]  %s582_s0, 1024, %s584_s13, [#allocation9], %s973_s3, %s973_s3, %s974_s14  }
 0x114   :  { %528 = vrot.lane.b32.xlu2 %v378_v5, %s970_s11 }
 0x126   :  { %v501_v29 = vpop.permute.xlu0 %500 }
 0x127   :  { %548 = vst.msk [vmem:[%s1230_s6] sm:$0xff] %vm467_vm0, %v501_v29 }
 0x12e   :  { %v503_v17 = vpop.permute.xlu0 %502  ;;  %v509_v25 = vpop.permute.xlu2 %508 }
 0x12f   :  { %549 = vst.msk [vmem:[%s1230_s6 + $0x8] sm:$0xff] %vm467_vm0, %v503_v17 }
 0x130   :  { %552 = vst.msk [vmem:[%s1230_s6 + $0x20] sm:$0xff] %vm467_vm0, %v509_v25 }
 0x136   :  { %v505_v36 = vpop.permute.xlu1 %504  ;;  %v511_v37 = vpop.permute.xlu2 %510 }
 0x137   :  { %550 = vst.msk [vmem:[%s1230_s6 + $0x10] sm:$0xff] %vm467_vm0, %v505_v36 }
 0x138   :  { %553 = vst.msk [vmem:[%s1230_s6 + $0x28] sm:$0xff] %vm467_vm0, %v511_v37 }
 0x13e   :  { %v507_v40 = vpop.permute.xlu1 %506 }
 0x13f   :  { %551 = vst.msk [vmem:[%s1230_s6 + $0x18] sm:$0xff] %vm467_vm0, %v507_v40 }
 0x14e   :  { %v517_v50 = vpop.permute.xlu2 %516 }
 0x14f   :  { %556 = vst.msk [vmem:[%s1230_s6 + $0x40] sm:$0xff] %vm467_vm0, %v517_v50 }
 0x156   :  { %v513_v57 = vpop.permute.xlu0 %512 }
 0x157   :  { %554 = vst.msk [vmem:[%s1230_s6 + $0x30] sm:$0xff] %vm467_vm0, %v513_v57 }
 0x15e   :  { %v515_v58 = vpop.permute.xlu1 %514 }
 0x15f   :  { %555 = vst.msk [vmem:[%s1230_s6 + $0x38] sm:$0xff] %vm467_vm0, %v515_v58 }
 0x165   :  { %v525_v44 = vpop.permute.xlu0 %524 }
 0x166   :  { %560 = vst.msk [vmem:[%s1230_s6 + $0x60] sm:$0xff] %vm467_vm0, %v525_v44  ;;  %v523_v59 = vpop.permute.xlu2 %522 }
 0x167   :  { %559 = vst.msk [vmem:[%s1230_s6 + $0x58] sm:$0xff] %vm467_vm0, %v523_v59 }
 0x16e   :  { %v519_v60 = vpop.permute.xlu0 %518  ;;  %v529_v61 = vpop.permute.xlu2 %528 }
 0x16f   :  { %557 = vst.msk [vmem:[%s1230_s6 + $0x48] sm:$0xff] %vm467_vm0, %v519_v60 }
 0x170   :  { %562 = vst.msk [vmem:[%s1230_s6 + $0x70] sm:$0xff] %vm467_vm0, %v529_v61 }
 0x176   :  { %v521_v62 = vpop.permute.xlu1 %520 }
 0x177   :  { %558 = vst.msk [vmem:[%s1230_s6 + $0x50] sm:$0xff] %vm467_vm0, %v521_v62 }
 0x17d   :  { %v531_v63 = vpop.permute.xlu0 %530 }
 0x17e   :  { %563 = vst.msk [vmem:[%s1230_s6 + $0x78] sm:$0xff] %vm467_vm0, %v531_v63  ;;  %v527_v0 = vpop.permute.xlu1 %526 }
 0x17f   :  { %561 = vst.msk [vmem:[%s1230_s6 + $0x68] sm:$0xff] %vm467_vm0, %v527_v0 }
 0x180   :  { %960 = dma.done.wait [#allocation4], 1024  }
 0x181   :  { %961 = vsyncadd [#allocation4], 4294966272 }
 0x182   :  { %962 = dma.done.wait [#allocation9], 1024  }
 0x183   :  { %963 = vsyncadd [#allocation9], 4294966272 }
 0x184   :  { %606 = vsyncpa [#allocation3], 1 }
 0x185   :  { %607 = vsyncpa [#allocation6], 1 }
 0x186   :  { %608 = vsyncpa [#allocation4], 1 }
 0x187   :  { %609 = vsyncpa [#allocation9], 1 }

</bundles_post_ra>
